<compile_context>
chip_gen: v5e
topology: v5e:2x2
jax: 0.10.0
libtpu: 0.0.40
codegen_flags: <defaults>
</compile_context>

<pallas_src>
from functools import partial

import jax
import jax.numpy as jnp
from jax import lax
from jax.experimental import pallas as pl
from jax.experimental.pallas import tpu as pltpu


def _coord_loss_kernel(o1_ref, o2_ref, g1_ref, g2_ref, v1_ref, v2_ref, out_ref,
                       *, J, C, inv_denom, expand_mask):
    # Coord refs hold one (B_TILE, J*C) tile; mask refs hold (B_TILE, J) if
    # expand_mask else (B_TILE, J*C); output is (B_TILE, 2) = [loss, order].
    o1 = o1_ref[...].astype(jnp.float32)
    o2 = o2_ref[...].astype(jnp.float32)
    g1 = g1_ref[...].astype(jnp.float32)
    g2 = g2_ref[...].astype(jnp.float32)
    v1 = v1_ref[...].astype(jnp.float32)
    v2 = v2_ref[...].astype(jnp.float32)

    if expand_mask:
        # Expand per-joint masks (B_TILE, J) -> (B_TILE, J*C) with a one-hot
        # matmul (lane l belongs to joint l // C).  MXU is idle here; HIGHEST
        # precision keeps arbitrary (non-binary) mask weights exact.
        JC = J * C
        lane = lax.broadcasted_iota(jnp.int32, (J, JC), 1)
        joint = lax.broadcasted_iota(jnp.int32, (J, JC), 0)
        expand = ((lane >= joint * C) & (lane < (joint + 1) * C)).astype(jnp.float32)
        v1 = jnp.dot(v1, expand, preferred_element_type=jnp.float32,
                     precision=lax.Precision.HIGHEST)
        v2 = jnp.dot(v2, expand, preferred_element_type=jnp.float32,
                     precision=lax.Precision.HIGHEST)

    # Four masked abs-diffs (shared between the two pairings).
    d11 = jnp.abs(o1 - g1) * v1   # out_e1 <-> gt_e1
    d22 = jnp.abs(o2 - g2) * v2   # out_e2 <-> gt_e2
    d12 = jnp.abs(o1 - g2) * v2   # out_e1 <-> gt_e2 (swapped)
    d21 = jnp.abs(o2 - g1) * v1   # out_e2 <-> gt_e1 (swapped)

    # Raw lane-axis sums; the 1/(J*C) mean scale is applied once after the min.
    s1 = jnp.sum(d11 + d22, axis=1, keepdims=True)   # (B_TILE, 1)
    s2 = jnp.sum(d12 + d21, axis=1, keepdims=True)   # (B_TILE, 1)

    out_ref[:, 0:1] = jnp.minimum(s1, s2) * inv_denom
    out_ref[:, 1:2] = (s1 < s2).astype(jnp.float32)


def _round_up(x, m):
    return (x + m - 1) // m * m


def coord_loss_order_invariant(coord_out_e1, coord_out_e2,
                               coord_gt_e1, coord_gt_e2,
                               valid_e1, valid_e2,
                               is_3D=None, return_order=False,
                               b_tile=4096, vmem_limit_bytes=None):
    """JAX/Pallas equivalent of CoordLossOrderInvariant.forward.

    coord_* : (B, J, C) float (or bf16)
    valid_* : broadcastable to (B, J, C)
    Returns loss_pf of shape (B,), plus pred_order (B,) if return_order.
    """
    del is_3D  # unused by the reference forward pass
    B, J, C = coord_out_e1.shape
    JC = J * C

    # --- Masks: keep them per-joint (B, J) whenever they do not actually vary
    # along the coordinate axis (the common case: (B, J, 1) / (B, 1, 1) / scalar).
    # Only a genuine per-coordinate mask is expanded to (B, JC) in the wrapper.
    def _to3(v):
        v = jnp.asarray(v, jnp.float32)
        while v.ndim < 3:
            v = v[None]
        return v

    v1_3, v2_3 = _to3(valid_e1), _to3(valid_e2)
    per_joint = (v1_3.shape[-1] == 1) and (v2_3.shape[-1] == 1)
    if per_joint:
        v1 = jnp.broadcast_to(v1_3[..., 0], (B, J))
        v2 = jnp.broadcast_to(v2_3[..., 0], (B, J))
        j_mask = J
    else:
        v1 = jnp.broadcast_to(v1_3, (B, J, C)).reshape(B, JC)
        v2 = jnp.broadcast_to(v2_3, (B, J, C)).reshape(B, JC)
        j_mask = JC

    # Coord tensors: contiguous reshape only (no pad, no copy).
    coords = tuple(x.reshape(B, JC) for x in (coord_out_e1, coord_out_e2,
                                              coord_gt_e1, coord_gt_e2))

    # --- Batch tile: multiple of 8 (sublane rule) unless it covers the whole
    # batch.  Keep >= 4 grid steps when there is enough work so the "parallel"
    # batch axis can actually be split across both TensorCores on v7x.
    bt = max(8, (int(b_tile) // 8) * 8)
    if B <= bt:
        bt = B                                   # single full block (any B, incl. B < 8)
    else:
        min_steps = 4
        if -(-B // bt) < min_steps and B >= min_steps * 8:
            bt = max(8, _round_up(-(-B // min_steps), 8))
    grid = (pl.cdiv(B, bt),)

    # --- VMEM budget from the real (lane/sublane padded) double-buffered footprint,
    # with headroom for compiler temporaries; capped under v7x's 64 MiB VMEM.
    if vmem_limit_bytes is None:
        lanes = lambda n: _round_up(max(n, 1), 128)
        rows = _round_up(bt, 8)
        io_bytes = 2 * rows * 4 * (4 * lanes(JC) + 2 * lanes(j_mask) + lanes(2))
        tmp_bytes = 8 * rows * 4 * lanes(JC)
        vmem_limit_bytes = max(16 << 20, min(io_bytes + tmp_bytes + (2 << 20), 56 << 20))

    kernel = partial(_coord_loss_kernel, J=J, C=C,
                     inv_denom=1.0 / float(JC),
                     expand_mask=per_joint and C > 1)

    coord_spec = pl.BlockSpec((bt, JC), lambda i: (i, 0))
    mask_spec = pl.BlockSpec((bt, j_mask), lambda i: (i, 0))
    out_spec = pl.BlockSpec((bt, 2), lambda i: (i, 0))

    cost = pl.CostEstimate(
        flops=10 * B * JC,
        transcendentals=0,
        bytes_accessed=4 * (4 * B * JC + 2 * B * j_mask + 2 * B))

    out = pl.pallas_call(
        kernel,
        out_shape=jax.ShapeDtypeStruct((B, 2), jnp.float32),
        grid=grid,
        in_specs=[coord_spec] * 4 + [mask_spec] * 2,
        out_specs=out_spec,
        compiler_params=pltpu.CompilerParams(
            dimension_semantics=("parallel",),       # megacore-shard batch on v7x
            vmem_limit_bytes=int(vmem_limit_bytes)),
        cost_estimate=cost,
    )(*coords, v1, v2)

    loss_pf = out[:, 0]
    if return_order:
        return loss_pf, out[:, 1]
    return loss_pf


def _reference(o1, o2, g1, g2, v1, v2):
    l1 = jnp.mean(jnp.abs(o1 - g1) * v1 + jnp.abs(o2 - g2) * v2, axis=(1, 2))
    l2 = jnp.mean(jnp.abs(o1 - g2) * v2 + jnp.abs(o2 - g1) * v1, axis=(1, 2))
    return jnp.minimum(l1, l2), (l1 < l2).astype(jnp.float32)


if __name__ == "__main__":
    B, J, C = 2, 8, 3  # batch, joints, coord-dim (x, y, z)
    key = jax.random.PRNGKey(0)
    k = jax.random.split(key, 6)

    coord_out_e1 = jax.random.normal(k[0], (B, J, C), dtype=jnp.float32)
    coord_out_e2 = jax.random.normal(k[1], (B, J, C), dtype=jnp.float32)
    coord_gt_e1 = jax.random.normal(k[2], (B, J, C), dtype=jnp.float32)
    coord_gt_e2 = jax.random.normal(k[3], (B, J, C), dtype=jnp.float32)
    valid_e1 = (jax.random.uniform(k[4], (B, J, 1)) > 0.2).astype(jnp.float32)
    valid_e2 = (jax.random.uniform(k[5], (B, J, 1)) > 0.2).astype(jnp.float32)

    loss_pf, pred_order = coord_loss_order_invariant(
        coord_out_e1, coord_out_e2, coord_gt_e1, coord_gt_e2,
        valid_e1, valid_e2, return_order=True)
    jax.block_until_ready((loss_pf, pred_order))

    ref_loss, ref_order = _reference(coord_out_e1, coord_out_e2,
                                     coord_gt_e1, coord_gt_e2,
                                     valid_e1, valid_e2)
    assert loss_pf.shape == (B,) and pred_order.shape == (B,)
    assert jnp.allclose(loss_pf, ref_loss, atol=1e-5, rtol=1e-5)
    assert jnp.array_equal(pred_order, ref_order)

    # Multi-step grid with a partial final block (B not a multiple of the tile).
    B2 = 37
    k2 = jax.random.split(jax.random.PRNGKey(1), 6)
    big = [jax.random.normal(k2[i], (B2, J, C), dtype=jnp.float32) for i in range(4)]
    m1 = (jax.random.uniform(k2[4], (B2, J, 1)) > 0.3).astype(jnp.float32)
    m2 = (jax.random.uniform(k2[5], (B2, J, 1)) > 0.3).astype(jnp.float32)
    loss_b, order_b = coord_loss_order_invariant(*big, m1, m2,
                                                 return_order=True, b_tile=16)
    jax.block_until_ready((loss_b, order_b))
    ref_lb, ref_ob = _reference(*big, m1, m2)
    assert jnp.allclose(loss_b, ref_lb, atol=1e-5, rtol=1e-5)
    assert jnp.array_equal(order_b, ref_ob)

    # Per-coordinate (B, J, C) mask fallback path.
    m1c = (jax.random.uniform(jax.random.PRNGKey(2), (B, J, C)) > 0.2).astype(jnp.float32)
    m2c = (jax.random.uniform(jax.random.PRNGKey(3), (B, J, C)) > 0.2).astype(jnp.float32)
    loss_c, order_c = coord_loss_order_invariant(
        coord_out_e1, coord_out_e2, coord_gt_e1, coord_gt_e2,
        m1c, m2c, return_order=True)
    jax.block_until_ready((loss_c, order_c))
    ref_lc, ref_oc = _reference(coord_out_e1, coord_out_e2,
                                coord_gt_e1, coord_gt_e2, m1c, m2c)
    assert jnp.allclose(loss_c, ref_lc, atol=1e-5, rtol=1e-5)
    assert jnp.array_equal(order_c, ref_oc)

    print("KERNEL_OK")
</pallas_src>

<mosaic_0001>
module attributes {stable_mosaic.version = 11 : i64} {
  func.func @_coord_loss_kernel(%arg0: i32, %arg1: memref<2x24xf32, #tpu.memory_space<vmem>>, %arg2: memref<2x24xf32, #tpu.memory_space<vmem>>, %arg3: memref<2x24xf32, #tpu.memory_space<vmem>>, %arg4: memref<2x24xf32, #tpu.memory_space<vmem>>, %arg5: memref<2x8xf32, #tpu.memory_space<vmem>>, %arg6: memref<2x8xf32, #tpu.memory_space<vmem>>, %arg7: memref<2x2xf32, #tpu.memory_space<vmem>>) attributes {dimension_semantics = [#tpu.dimension_semantics<parallel>], iteration_bounds = array<i64: 1>, scalar_prefetch = 0 : i64, scratch_operands = 0 : i64, tpu.core_type = #tpu.core_type<tc>, window_params = [{transform_indices = @transform_0, window_bounds = array<i64: 2, 24>}, {transform_indices = @transform_1, window_bounds = array<i64: 2, 24>}, {transform_indices = @transform_2, window_bounds = array<i64: 2, 24>}, {transform_indices = @transform_3, window_bounds = array<i64: 2, 24>}, {transform_indices = @transform_4, window_bounds = array<i64: 2, 8>}, {transform_indices = @transform_5, window_bounds = array<i64: 2, 8>}, {transform_indices = @transform_6, window_bounds = array<i64: 2, 2>}]} {
    %c0 = arith.constant 0 : index
    %c0_0 = arith.constant 0 : index
    %0 = vector.load %arg1[%c0, %c0_0] : memref<2x24xf32, #tpu.memory_space<vmem>>, vector<2x24xf32>
    %c0_1 = arith.constant 0 : index
    %c0_2 = arith.constant 0 : index
    %1 = vector.load %arg2[%c0_1, %c0_2] : memref<2x24xf32, #tpu.memory_space<vmem>>, vector<2x24xf32>
    %c0_3 = arith.constant 0 : index
    %c0_4 = arith.constant 0 : index
    %2 = vector.load %arg3[%c0_3, %c0_4] : memref<2x24xf32, #tpu.memory_space<vmem>>, vector<2x24xf32>
    %c0_5 = arith.constant 0 : index
    %c0_6 = arith.constant 0 : index
    %3 = vector.load %arg4[%c0_5, %c0_6] : memref<2x24xf32, #tpu.memory_space<vmem>>, vector<2x24xf32>
    %c0_7 = arith.constant 0 : index
    %c0_8 = arith.constant 0 : index
    %4 = vector.load %arg5[%c0_7, %c0_8] : memref<2x8xf32, #tpu.memory_space<vmem>>, vector<2x8xf32>
    %c0_9 = arith.constant 0 : index
    %c0_10 = arith.constant 0 : index
    %5 = vector.load %arg6[%c0_9, %c0_10] : memref<2x8xf32, #tpu.memory_space<vmem>>, vector<2x8xf32>
    %6 = tpu.iota {dimensions = array<i32: 1>} : vector<8x24xi32>
    %7 = tpu.iota {dimensions = array<i32: 0>} : vector<8x24xi32>
    %c3_i32 = arith.constant 3 : i32
    %8 = vector.broadcast %c3_i32 : i32 to vector<8x24xi32>
    %9 = arith.muli %7, %8 : vector<8x24xi32>
    %10 = arith.cmpi sge, %6, %9 : vector<8x24xi32>
    %c1_i32 = arith.constant 1 : i32
    %11 = vector.broadcast %c1_i32 : i32 to vector<8x24xi32>
    %12 = arith.addi %7, %11 : vector<8x24xi32>
    %c3_i32_11 = arith.constant 3 : i32
    %13 = vector.broadcast %c3_i32_11 : i32 to vector<8x24xi32>
    %14 = arith.muli %12, %13 : vector<8x24xi32>
    %15 = arith.cmpi slt, %6, %14 : vector<8x24xi32>
    %16 = arith.andi %10, %15 : vector<8x24xi1>
    %17 = arith.extui %16 : vector<8x24xi1> to vector<8x24xi32>
    %18 = arith.sitofp %17 : vector<8x24xi32> to vector<8x24xf32>
    %cst = arith.constant dense<0.000000e+00> : vector<2x24xf32>
    %19 = tpu.matmul %4, %18, %cst {dimension_numbers = #tpu.dot_dimension_numbers<[1], [0], [0], [1], [0, 0, 1, 1], [], []>, precision = #tpu.contract_precision<fp32>} : vector<2x8xf32>, vector<8x24xf32>, vector<2x24xf32> -> vector<2x24xf32>
    %cst_12 = arith.constant dense<0.000000e+00> : vector<2x24xf32>
    %20 = tpu.matmul %5, %18, %cst_12 {dimension_numbers = #tpu.dot_dimension_numbers<[1], [0], [0], [1], [0, 0, 1, 1], [], []>, precision = #tpu.contract_precision<fp32>} : vector<2x8xf32>, vector<8x24xf32>, vector<2x24xf32> -> vector<2x24xf32>
    %21 = arith.subf %0, %2 : vector<2x24xf32>
    %22 = math.absf %21 : vector<2x24xf32>
    %23 = arith.mulf %22, %19 : vector<2x24xf32>
    %24 = arith.subf %1, %3 : vector<2x24xf32>
    %25 = math.absf %24 : vector<2x24xf32>
    %26 = arith.mulf %25, %20 : vector<2x24xf32>
    %27 = arith.subf %0, %3 : vector<2x24xf32>
    %28 = math.absf %27 : vector<2x24xf32>
    %29 = arith.mulf %28, %20 : vector<2x24xf32>
    %30 = arith.subf %1, %2 : vector<2x24xf32>
    %31 = math.absf %30 : vector<2x24xf32>
    %32 = arith.mulf %31, %19 : vector<2x24xf32>
    %33 = arith.addf %23, %26 : vector<2x24xf32>
    %cst_13 = arith.constant dense<0.000000e+00> : vector<2xf32>
    %34 = vector.multi_reduction <add>, %33, %cst_13 [1] : vector<2x24xf32> to vector<2xf32>
    %35 = vector.shape_cast %34 : vector<2xf32> to vector<2x1xf32>
    %36 = arith.addf %29, %32 : vector<2x24xf32>
    %cst_14 = arith.constant dense<0.000000e+00> : vector<2xf32>
    %37 = vector.multi_reduction <add>, %36, %cst_14 [1] : vector<2x24xf32> to vector<2xf32>
    %38 = vector.shape_cast %37 : vector<2xf32> to vector<2x1xf32>
    %39 = arith.minimumf %35, %38 : vector<2x1xf32>
    %cst_15 = arith.constant 0.0416666679 : f32
    %40 = vector.broadcast %cst_15 : f32 to vector<2x1xf32>
    %41 = arith.mulf %39, %40 : vector<2x1xf32>
    %c0_16 = arith.constant 0 : index
    %c0_17 = arith.constant 0 : index
    %42 = vector.load %arg7[%c0_16, %c0_17] : memref<2x2xf32, #tpu.memory_space<vmem>>, vector<2x1xf32>
    tpu.vector_store %arg7[%c0_16, %c0_17], %41 {strides = array<i32>} : memref<2x2xf32, #tpu.memory_space<vmem>>, vector<2x1xf32>,
    %43 = arith.cmpf olt, %35, %38 : vector<2x1xf32>
    %44 = arith.extui %43 : vector<2x1xi1> to vector<2x1xi32>
    %45 = arith.sitofp %44 : vector<2x1xi32> to vector<2x1xf32>
    %c0_18 = arith.constant 0 : index
    %c1 = arith.constant 1 : index
    %46 = vector.load %arg7[%c0_18, %c1] : memref<2x2xf32, #tpu.memory_space<vmem>>, vector<2x1xf32>
    tpu.vector_store %arg7[%c0_18, %c1], %45 {strides = array<i32>} : memref<2x2xf32, #tpu.memory_space<vmem>>, vector<2x1xf32>,
    return
  }
  func.func @transform_0(%arg0: i32) -> (i32, i32) {
    %c0_i32 = arith.constant 0 : i32
    %c0_i32_0 = arith.constant 0 : i32
    return %arg0, %c0_i32 : i32, i32
  }
  func.func @transform_1(%arg0: i32) -> (i32, i32) {
    %c0_i32 = arith.constant 0 : i32
    %c0_i32_0 = arith.constant 0 : i32
    return %arg0, %c0_i32 : i32, i32
  }
  func.func @transform_2(%arg0: i32) -> (i32, i32) {
    %c0_i32 = arith.constant 0 : i32
    %c0_i32_0 = arith.constant 0 : i32
    return %arg0, %c0_i32 : i32, i32
  }
  func.func @transform_3(%arg0: i32) -> (i32, i32) {
    %c0_i32 = arith.constant 0 : i32
    %c0_i32_0 = arith.constant 0 : i32
    return %arg0, %c0_i32 : i32, i32
  }
  func.func @transform_4(%arg0: i32) -> (i32, i32) {
    %c0_i32 = arith.constant 0 : i32
    %c0_i32_0 = arith.constant 0 : i32
    return %arg0, %c0_i32 : i32, i32
  }
  func.func @transform_5(%arg0: i32) -> (i32, i32) {
    %c0_i32 = arith.constant 0 : i32
    %c0_i32_0 = arith.constant 0 : i32
    return %arg0, %c0_i32 : i32, i32
  }
  func.func @transform_6(%arg0: i32) -> (i32, i32) {
    %c0_i32 = arith.constant 0 : i32
    %c0_i32_0 = arith.constant 0 : i32
    return %arg0, %c0_i32 : i32, i32
  }
}

</mosaic_0001>

<bundles_post_ra>
// kernel: tpu_custom_call.1
= control target key start
LH: loop header
LB: loop body
LE: loop exit
PB: predicated region body
PF: predicated region fallthrough
CT: control target
= control target key end

     0   :  { %11 = vsyncpa [#allocation3], 0  ;;  %s671_s0 = inlined_call_operand.hbm [shape: f32[2,24], index: 0, kind: input, shape index: {}]   ;;  %s672_s1 = inlined_call_operand.hbm [shape: f32[2,24], index: 1, kind: input, shape index: {}]   ;;  %s673_s2 = inlined_call_operand.hbm [shape: f32[2,24], index: 2, kind: input, shape index: {}]   ;;  %s674_s3 = inlined_call_operand.vmem [shape: f32[2,24], index: 3, kind: input, shape index: {}]   ;;  %s675_s4 = inlined_call_operand.hbm [shape: f32[2,8], index: 4, kind: input, shape index: {}]   ;;  %s676_s5 = inlined_call_operand.vmem [shape: f32[2,8], index: 5, kind: input, shape index: {}]   ;;  %s677_s6 = inlined_call_operand.hbm [shape: f32[2,2], index: 6, kind: output, shape index: {}]  }
   0x1   :  { %12 = vsyncpa [#allocation6], 0 }
   0x2   :  { %13 = vsyncpa [#allocation9], 0  ;;  %s31_s23 = sshll.u32 %s672_s1, 4  ;;  %s32_s23 = int_to_ptr.hbm [resolvable:$true] %s31_s23 }
   0x3   :  { %14 = vsyncpa [#allocation4], 0  ;;  %s588_s24 = smov [#allocation5]   ;;  %s20_s28 = sshll.u32 %s671_s0, 4  ;;  %s21_s28 = int_to_ptr.hbm [resolvable:$true] %s20_s28 }
   0x4   :  { %s33_s25 = sshll.u32 %s588_s24, 4  ;;  %s589_s29 = smov [#allocation2]   ;;  %s34_s25 = int_to_ptr.vmem [resolvable:$true] %s33_s25 }
   0x5   :  { %36 = dma.hbm_to_vmem [thread:$0]  %s32_s23, 32, %s34_s25, [#allocation6]  }
   0x6   :  { %s22_s30 = sshll.u32 %s589_s29, 4  ;;  %s42_s9 = sshll.u32 %s673_s2, 4  ;;  %s23_s30 = int_to_ptr.vmem [resolvable:$true] %s22_s30  ;;  %s43_s9 = int_to_ptr.hbm [resolvable:$true] %s42_s9 }
   0x7   :  { %25 = dma.hbm_to_vmem [thread:$0]  %s21_s28, 32, %s23_s30, [#allocation3]  }
   0x8   :  { %s55_s11 = sshll.u32 %s675_s4, 4  ;;  %s590_s12 = smov [#allocation7]   ;;  %s56_s11 = int_to_ptr.hbm [resolvable:$true] %s55_s11 }
   0x9   :  { %s44_s13 = sshll.u32 %s590_s12, 4  ;;  %s591_s0 = smov [#allocation8]   ;;  %s45_s13 = int_to_ptr.vmem [resolvable:$true] %s44_s13 }
   0xa   :  { %47 = dma.hbm_to_vmem [thread:$0]  %s43_s9, 32, %s45_s13, [#allocation6]  }
   0xb   :  { %s57_s14 = sshll.u32 %s591_s0, 4  ;;  %s58_s14 = int_to_ptr.vmem [resolvable:$true] %s57_s14 }
   0xc   :  { %60 = dma.hbm_to_vmem [thread:$0]  %s56_s11, 32, %s58_s14, [#allocation9]  }
   0xd   :  { %580 = dma.done.wait [#allocation3], 32  }
   0xe   :  { %581 = vsyncadd [#allocation3], 4294967264 }
   0xf   :  { %582 = dma.done.wait [#allocation6], 64  }
  0x10   :  { %583 = vsyncadd [#allocation6], 4294967232 }
  0x11   :  { %584 = dma.done.wait [#allocation9], 32  }
  0x12   :  { %585 = vsyncadd [#allocation9], 4294967264  ;;  %v85_v0 = vlaneseq  ;;  %vm97_vm0 = vcmask 64512   ;;  %v83_v6 = vld [vmem:[#allocation8] sm:$0x3]  ;;  %v592_v13 = vmov 0.0  }
  0x13   :  { %v84_v7 = vld [vmem:[%s676_s5] sm:$0x3]  ;;  %v99_v8 = vsel %vm97_vm0, %v83_v6, 0  ;;  %v593_v15 = vmov 1.0   ;;  %v81_v40 = vld [vmem:[#allocation7] sm:$0x3] }
  0x14   :  { %v86_v1 = vand.u32 127, %v85_v0  ;;  %v88_v2 = vshrl.u32 %v85_v0, 7  ;;  %v248_v9 = vsel %vm97_vm0, %v84_v7, 0  ;;  %v118_v11 = vand.u32 4294901760, %v99_v8  ;;  %v79_v39 = vld [vmem:[#allocation2] sm:$0x3] }
  0x15   :  { %v267_v12 = vand.u32 4294901760, %v248_v9  ;;  %v82_v41 = vld [vmem:[%s674_s3] sm:$0x3]  ;;  %v80_v43 = vld [vmem:[#allocation5] sm:$0x3]  ;;  %v396_v44 = vsub.f32 %v79_v39, %v81_v40  ;;  %vm409_vm4 = vcmask 189440  }
  0x16   :  { %v89_v3 = vmul.u32 3, %v88_v2  ;;  %v91_v4 = vadd.s32 1, %v88_v2  ;;  %v119_v17 = vsub.f32 %v99_v8, %v118_v11  ;;  %v399_v49 = vsub.f32 %v80_v43, %v82_v41  ;;  %s594_s3 = smov [#allocation10]   ;;  %s433_s19 = sshll.u32 %s677_s6, 4  ;;  %s434_s19 = int_to_ptr.hbm [resolvable:$true] %s433_s19 }
  0x17   :  { %v268_v18 = vsub.f32 %v248_v9, %v267_v12  ;;  %v397_v52 = vand.u32 2147483647, %v396_v44  ;;  %v402_v57 = vsub.f32 %v79_v39, %v82_v41  ;;  %v405_v58 = vsub.f32 %v80_v43, %v81_v40  ;;  %s431_s16 = sshll.u32 %s594_s3, 4  ;;  %s432_s16 = int_to_ptr.vmem [resolvable:$true] %s431_s16 }
  0x18   :  { %vm90_vm1 = vcmp.ge.s32.totalorder %v86_v1, %v89_v3  ;;  %v92_v5 = vmul.u32 3, %v91_v4  ;;  %v120_v19 = vand.u32 4294901760, %v119_v17  ;;  %v400_v56 = vand.u32 2147483647, %v399_v49 }
  0x19   :  { %v269_v21 = vand.u32 4294901760, %v268_v18  ;;  %v403_v62 = vand.u32 2147483647, %v402_v57  ;;  %v406_v63 = vand.u32 2147483647, %v405_v58  ;;  %vm419_vm5 = vcmask 1024  }
  0x1a   :  { %vm93_vm2 = vcmp.lt.s32.totalorder %v86_v1, %v92_v5  ;;  %v121_v22 = vsub.f32 %v119_v17, %v120_v19  ;;  %vm424_vm7 = vcmask 9224  }
  0x1b   :  { %vm645_vm3 = vmand %vm90_vm1, %vm93_vm2  ;;  %v270_v24 = vsub.f32 %v268_v18, %v269_v21 }
  0x1c   :  { %v445_v14 = vsel %vm645_vm3, 1.0, %v592_v13  ;;  %447 = vmatpush.msk.msra.mxu3 %vm645_vm3, %v593_v15  ;;  %446 = vmatpush.msk.msra.mxu0 %vm645_vm3, %v593_v15  ;;  %v122_v25 = vand.u32 4294901760, %v121_v22 }
  0x1d   :  { %v143_v16 = vsub.f32 %v445_v14, %v445_v14  ;;  %197 = vmatmul.f32.vlgmr.msra.gmra.mxu3 %v120_v19  ;;  %v271_v27 = vand.u32 4294901760, %v270_v24 }
  0x1e   :  { %123 = vmatmul.f32.vlgmr.msra.gmra.mxu0 %v122_v25 }
  0x1f   :  { %170 = vmatpush.msra.mxu2 %v143_v16  ;;  %v144_v20 = vand.u32 4294901760, %v143_v16 }
  0x20   :  { %173 = vmatmul.f32.vlgmr.msra.gmra.mxu2 %v119_v17 }
  0x21   :  { %449 = vmatpush.msk.msrb.mxu2 %vm645_vm3, %v593_v15  ;;  %v145_v23 = vsub.f32 %v143_v16, %v144_v20  ;;  %219 = vmatpush.msrb.mxu0 %v144_v20 }
  0x23   :  { %368 = vmatpush.msra.mxu2 %v144_v20  ;;  %v146_v26 = vand.u32 4294901760, %v145_v23  ;;  %319 = vmatpush.msra.mxu0 %v143_v16 }
  0x25   :  { %147 = vmatpush.msra.mxu1 %v146_v26  ;;  %296 = vmatpush.msrb.mxu3 %v146_v26 }
  0x26   :  { %149 = vmatmul.f32.vlgmr.msra.gmra.mxu1 %v118_v11  ;;  %298 = vmatmul.f32.vlgmr.msrb.gmra.mxu3 %v267_v12 }
  0x27   :  { %448 = vmatpush.msk.msrb.mxu1 %vm645_vm3, %v593_v15  ;;  %451 = vmatpush.msk.msra.mxu3 %vm645_vm3, %v593_v15 }
  0x28   :  { %272 = vmatmul.f32.vlgmr.msrb.gmra.mxu2 %v271_v27  ;;  %221 = vmatmul.f32.vlgmr.msrb.gmra.mxu0 %v118_v11 }
  0x29   :  { %450 = vmatpush.msk.msra.mxu1 %vm645_vm3, %v593_v15 }
  0x2e   :  { %243 = vmatmul.f32.vlgmr.msrb.gmra.mxu1 %v118_v11  ;;  %392 = vmatmul.f32.vlgmr.msra.gmra.mxu3 %v267_v12 }
  0x30   :  { %370 = vmatmul.f32.vlgmr.msra.gmra.mxu2 %v267_v12  ;;  %322 = vmatmul.f32.vlgmr.msra.gmra.mxu0 %v268_v18 }
  0x36   :  { %346 = vmatmul.f32.vlgmr.msra.gmra.mxu1 %v269_v21 }
  0x9b   :  { %v124_v28 = vpop.f32.mrf.mxu0 }
  0xa0   :  { %v198_v31 = vpop.f32.mrf.mxu3 }
  0xa3   :  { %v150_v29 = vpop.f32.mrf.mxu1  ;;  %v174_v30 = vpop.f32.mrf.mxu2 }
  0xa4   :  { %v151_v32 = vadd.f32 %v150_v29, %v124_v28 }
  0xa5   :  { %v222_v33 = vpop.f32.mrf.mxu0 }
  0xa6   :  { %v175_v34 = vadd.f32 %v174_v30, %v151_v32 }
  0xa8   :  { %v199_v38 = vadd.f32 %v198_v31, %v175_v34 }
  0xa9   :  { %v299_v37 = vpop.f32.mrf.mxu3 }
  0xaa   :  { %v223_v46 = vadd.f32 %v222_v33, %v199_v38 }
  0xab   :  { %v244_v35 = vpop.f32.mrf.mxu1  ;;  %v273_v36 = vpop.f32.mrf.mxu2 }
  0xac   :  { %v300_v42 = vadd.f32 %v299_v37, %v273_v36  ;;  %v245_v54 = vadd.f32 %v244_v35, %v223_v46 }
  0xad   :  { %v323_v45 = vpop.f32.mrf.mxu0 }
  0xae   :  { %v324_v47 = vadd.f32 %v323_v45, %v300_v42  ;;  %v398_v60 = vmul.f32 %v397_v52, %v245_v54  ;;  %v407_v3 = vmul.f32 %v406_v63, %v245_v54 }
  0xb1   :  { %v393_v53 = vpop.f32.mrf.mxu3 }
  0xb3   :  { %v347_v48 = vpop.f32.mrf.mxu1  ;;  %v371_v50 = vpop.f32.mrf.mxu2 }
  0xb4   :  { %v348_v51 = vadd.f32 %v347_v48, %v324_v47 }
  0xb6   :  { %v372_v55 = vadd.f32 %v371_v50, %v348_v51 }
  0xb8   :  { %v394_v59 = vadd.f32 %v393_v53, %v372_v55 }
  0xba   :  { %v401_v61 = vmul.f32 %v400_v56, %v394_v59  ;;  %v404_v1 = vmul.f32 %v403_v62, %v394_v59 }
  0xbc   :  { %v408_v0 = vadd.f32 %v401_v61, %v398_v60  ;;  %v413_v4 = vadd.f32 %v407_v3, %v404_v1 }
  0xbe   :  { %v410_v2 = vsel %vm409_vm4, %v408_v0, 0.0  ;;  %v414_v5 = vsel %vm409_vm4, %v413_v4, 0.0 }
  0xbf   :  { %411 = vadd.xlane.f32.xlu0 %v410_v2 }
  0xc7   :  { %415 = vadd.xlane.f32.xlu0 %v414_v5 }
 0x132   :  { %v412_v6 = vpop.xlane.xlu0 %411 }
 0x13a   :  { %v416_v7 = vpop.xlane.xlu0 %415 }
 0x13b   :  { %v417_v8 = vmin.f32 %v412_v6, %v416_v7  ;;  %vm421_vm6 = vcmp.lt.f32.partialorder %v412_v6, %v416_v7 }
 0x13c   :  { %v452_v10 = vsel %vm421_vm6, 1.0, %v592_v13 }
 0x13d   :  { %v418_v9 = vmul.f32 0.041666668, %v417_v8 }
 0x13f   :  { %420 = vst.msk [vmem:[#allocation10] sm:$0x3] %vm419_vm5, %v418_v9 }
 0x140   :  { %425 = vst.msk [vmem:[#allocation10] sm:$0x3] %vm424_vm7, %v452_v10 }
 0x141   :  { %436 = dma.vmem_to_hbm [thread:$0]  %s432_s16, 32, %s434_s19, [#allocation4]  }
 0x142   :  { %586 = dma.done.wait [#allocation4], 32  }
 0x143   :  { %587 = vsyncadd [#allocation4], 4294967264 }
 0x144   :  { %441 = vsyncpa [#allocation3], 1 }
 0x145   :  { %442 = vsyncpa [#allocation6], 1 }
 0x146   :  { %443 = vsyncpa [#allocation9], 1 }
 0x147   :  { %444 = vsyncpa [#allocation4], 1 }

</bundles_post_ra>
